<compile_context>
chip_gen: v7x
topology: tpu7x:2x2x1
jax: 0.10.0
libtpu: 0.0.40
codegen_flags: <defaults>
</compile_context>

<pallas_src>
import functools
import math

import jax
import jax.numpy as jnp
from jax.experimental import pallas as pl
from jax.experimental.pallas import tpu as pltpu

_HIGHEST = jax.lax.Precision.HIGHEST
_STEP_OVERHEAD_ELEMS = 1 << 18      # ~0.35 us grid-step overhead, in "elements"


def _round_up(x, m):
    return (x + m - 1) // m * m


def _vmem_budget_bytes():
    """Returns (tile-selection budget, vmem_limit_bytes), generation-aware."""
    cap = 64 * 1024 * 1024                    # conservative default: v7x per-core VMEM
    get_info = getattr(pltpu, "get_tpu_info", None)
    if get_info is not None:
        try:
            cap = int(getattr(get_info(), "vmem_capacity_bytes", cap) or cap)
        except Exception:
            pass
    limit = min(int(cap * 0.8), 100 * 1024 * 1024)
    budget = int(limit * 0.75)                # headroom for compiler-internal scratch
    return budget, limit


def _choose_tiles(batch, k_aug, o_pad, budget):
    """VMEM-budget-driven (TM, TK, B_pad)."""
    b8 = _round_up(batch, 8)
    if b8 <= 512:
        tk = b8
        # v7x shards the "parallel" row axis over its 2 TensorCores: give it
        # >=2 row tiles when the batch splits on an 8-row boundary.
        tm = b8 // 2 if (b8 >= 256 and b8 % 16 == 0) else b8
        return tm, tk, b8

    def ws(tm, tk):                       # per-step working set, double-buffered
        return (2 * 2 * tm * k_aug        # augmented codes, row tile (bf16)
                + 2 * 2 * tk * k_aug      # augmented codes, col tile (bf16)
                + 2 * 4 * tk * o_pad      # support tile (worst case: streamed)
                + 2 * 4 * tm * o_pad      # resident output tile (f32)
                + 2 * 4 * o_pad)          # bias

    candidates = ((512, 1024), (512, 512), (256, 512), (256, 256),
                  (128, 256), (128, 128))
    feasible = [c for c in candidates if ws(*c) <= budget] or [(128, 128)]

    def cost(c):                          # padded compute + per-step overhead
        tm, tk = c
        b_pad = _round_up(batch, max(tm, tk))
        steps = (b_pad // tm) * (b_pad // tk)
        return b_pad * b_pad + steps * _STEP_OVERHEAD_ELEMS

    tm, tk = min(feasible, key=cost)
    return tm, tk, _round_up(batch, max(tm, tk))


# ---------------------------------------------------------------------------
# Kernel 1: support = z @ W  (hoisted out of the adjacency reduction loop)
# ---------------------------------------------------------------------------
def _support_kernel(z_ref, w_ref, o_ref):
    o_ref[...] = jnp.dot(z_ref[...], w_ref[...],
                         preferred_element_type=jnp.float32,
                         precision=_HIGHEST)


# ---------------------------------------------------------------------------
# Kernel 2: fused adjacency tile + GCN accumulation (into o_ref) + sigmoid.
#   c1 + c2 = [2h_i, s_i, 1] @ [h_j, -1, -s_j].T   (single bf16 MXU matmul)
#   adj     = max(1 - |c1 + c2| / K, 0) ** 1.4
#   out     = sigmoid(adj @ support + b)
# ---------------------------------------------------------------------------
def _tbh_kernel(hl_ref, hr_ref, sup_ref, b_ref, o_ref, *,
                inv_code_length, tk, sup_resident):
    k = pl.program_id(1)

    # One MXU matmul (bf16 operands, f32 accumulate), contracting axis 1 of
    # both operands -> no transpose, no rank-1 correction on the VPU.
    c = jax.lax.dot_general(
        hl_ref[...], hr_ref[...],
        dimension_numbers=(((1,), (1,)), ((), ())),
        preferred_element_type=jnp.float32)                        # [TM, TK]

    base = jnp.maximum(1.0 - jnp.abs(c) * inv_code_length, 0.0)
    adj = jnp.power(base, 1.4)                                     # EUP exp/log

    if sup_resident:
        # whole support array resident in VMEM; slice the k-th row block.
        sup = sup_ref[pl.ds(pl.multiple_of(k * tk, tk), tk), :]
    else:
        sup = sup_ref[...]

    contrib = jnp.dot(adj, sup, preferred_element_type=jnp.float32,
                      precision=_HIGHEST)                          # [TM, O_pad]

    @pl.when(k == 0)
    def _():
        o_ref[...] = contrib

    @pl.when(k > 0)
    def _():
        o_ref[...] = o_ref[...] + contrib

    @pl.when(k == pl.num_programs(1) - 1)
    def _():
        o_ref[...] = jax.nn.sigmoid(o_ref[...] + b_ref[...])


# ---------------------------------------------------------------------------
# Wrapper
# ---------------------------------------------------------------------------
def twin_bottleneck(hashing, z, weight, bias):
    B, K = hashing.shape
    Bz, D = z.shape
    O = weight.shape[1]
    assert Bz == B and weight.shape[0] == D

    K_aug = K + 2                              # [2h, s, 1] augmented codes
    O_pad = _round_up(O, 128)                  # lane-dense output

    budget, vmem_limit = _vmem_budget_bytes()
    TM, TK, B_pad = _choose_tiles(B, K_aug, O_pad, budget)

    # --- padding + augmented code construction (exact in bf16 for binary h) --
    h_p = jnp.pad(hashing.astype(jnp.float32), ((0, B_pad - B), (0, 0)))
    s = jnp.sum(h_p, axis=1, keepdims=True)                 # integer rowsums
    ones = jnp.ones((B_pad, 1), jnp.float32)
    h_lhs = jnp.concatenate([2.0 * h_p, s, ones], axis=1).astype(jnp.bfloat16)
    h_rhs = jnp.concatenate([h_p, -ones, -s], axis=1).astype(jnp.bfloat16)

    z_p = jnp.pad(z.astype(jnp.float32), ((0, B_pad - B), (0, 0)))
    w_p = jnp.pad(weight.astype(jnp.float32), ((0, 0), (0, O_pad - O)))
    b_p = jnp.pad(jnp.reshape(bias, (1, O)).astype(jnp.float32),
                  ((0, 0), (0, O_pad - O)))

    # --- support = z @ W (computed once, tiled over rows x output columns) ---
    def _sup_ws(tr, to):
        return 2 * 4 * (tr * D + D * to + tr * to)

    TR, TO = TK, O_pad
    if _sup_ws(TR, TO) > budget and O_pad > 128:
        TO = 128
    if _sup_ws(TR, TO) > budget and TR > 128 and B_pad % 128 == 0:
        TR = 128
    # TODO(synk): for very large in_dim D the z@W kernel would also need a
    # D-reduction grid axis (accumulator); not needed at these sizes.

    support = pl.pallas_call(
        _support_kernel,
        out_shape=jax.ShapeDtypeStruct((B_pad, O_pad), jnp.float32),
        grid=(B_pad // TR, O_pad // TO),
        in_specs=[pl.BlockSpec((TR, D), lambda r, c: (r, 0)),
                  pl.BlockSpec((D, TO), lambda r, c: (0, c))],
        out_specs=pl.BlockSpec((TR, TO), lambda r, c: (r, c)),
        compiler_params=pltpu.CompilerParams(
            dimension_semantics=("parallel", "parallel"),
            vmem_limit_bytes=vmem_limit),
        cost_estimate=pl.CostEstimate(
            flops=2 * B_pad * D * O_pad,
            transcendentals=0,
            bytes_accessed=4 * (B_pad * D * (O_pad // TO)
                                + D * O_pad * (B_pad // TR)
                                + B_pad * O_pad)),
    )(z_p, w_p)

    # --- fused adjacency + GCN + sigmoid -------------------------------------
    n_i = B_pad // TM
    n_k = B_pad // TK

    # Keep the whole support array resident in VMEM when it (plus the rest of
    # the per-step working set) fits the budget -> no per-(i,k) re-reads.
    other_ws = (2 * 2 * TM * K_aug + 2 * 2 * TK * K_aug
                + 2 * 4 * TM * O_pad + 2 * 4 * O_pad)
    sup_resident = (2 * 4 * B_pad * O_pad + other_ws) <= budget

    sup_spec = (pl.BlockSpec((B_pad, O_pad), lambda i, k: (0, 0)) if sup_resident
                else pl.BlockSpec((TK, O_pad), lambda i, k: (k, 0)))

    kernel = functools.partial(_tbh_kernel,
                               inv_code_length=1.0 / float(K),
                               tk=TK,
                               sup_resident=sup_resident)

    bytes_main = (2 * B_pad * K_aug                          # h_lhs: once per row tile
                  + 2 * B_pad * K_aug * n_i                  # h_rhs: per row tile
                  + 4 * B_pad * O_pad * (1 if sup_resident else n_i)
                  + 4 * B_pad * O_pad                        # output writeback
                  + 4 * O_pad)                               # bias

    out_p = pl.pallas_call(
        kernel,
        out_shape=jax.ShapeDtypeStruct((B_pad, O_pad), jnp.float32),
        grid=(n_i, n_k),
        in_specs=[
            pl.BlockSpec((TM, K_aug), lambda i, k: (i, 0)),   # augmented codes, rows
            pl.BlockSpec((TK, K_aug), lambda i, k: (k, 0)),   # augmented codes, cols
            sup_spec,                                         # support (z @ W)
            pl.BlockSpec((1, O_pad), lambda i, k: (0, 0)),    # bias
        ],
        out_specs=pl.BlockSpec((TM, O_pad), lambda i, k: (i, 0)),
        compiler_params=pltpu.CompilerParams(
            dimension_semantics=("parallel", "arbitrary"),
            vmem_limit_bytes=vmem_limit),
        cost_estimate=pl.CostEstimate(
            flops=2 * B_pad * B_pad * (K_aug + O_pad) + 6 * B_pad * B_pad,
            transcendentals=2 * B_pad * B_pad + B_pad * O_pad,
            bytes_accessed=int(bytes_main)),
    )(h_lhs, h_rhs, support, b_p)

    return out_p[:B, :O]


if __name__ == "__main__":
    # Small shapes consistent with the module:
    #   hashing: [B, code_len], z: [B, in_dim], GCN: in_dim -> out_dim
    B, code_len, in_dim, out_dim = 8, 32, 32, 16

    key = jax.random.PRNGKey(0)
    k_h, k_z, k_w, k_b = jax.random.split(key, 4)

    # Binary-like hashing codes (as TBH produces after quantization).
    hashing = jax.random.bernoulli(k_h, 0.5, (B, code_len)).astype(jnp.float32)
    z = jax.random.normal(k_z, (B, in_dim), dtype=jnp.float32)

    # GraphConvolution.reset_parameters: uniform(-stdv, stdv), stdv=1/sqrt(out).
    stdv = 1.0 / math.sqrt(out_dim)
    weight = jax.random.uniform(k_w, (in_dim, out_dim),
                                minval=-stdv, maxval=stdv, dtype=jnp.float32)
    bias = jax.random.uniform(k_b, (out_dim,),
                              minval=-stdv, maxval=stdv, dtype=jnp.float32)

    out = twin_bottleneck(hashing, z, weight, bias)
    jax.block_until_ready(out)

    # Pure-JAX reference check (mirrors the PyTorch module exactly).
    m1 = hashing - 1.0
    adj = jnp.power(1.0 - jnp.abs(hashing @ m1.T + m1 @ hashing.T) / code_len, 1.4)
    ref = jax.nn.sigmoid(adj @ (z @ weight) + bias[None, :])
    assert out.shape == ref.shape
    assert jnp.allclose(out, ref, atol=1e-5, rtol=1e-5), "mismatch vs reference"

    print("KERNEL_OK")
</pallas_src>

<mosaic_0001>
module attributes {stable_mosaic.version = 11 : i64} {
  func.func @_support_kernel(%arg0: i32, %arg1: i32, %arg2: memref<8x32xf32, #tpu.memory_space<vmem>>, %arg3: memref<32x128xf32, #tpu.memory_space<vmem>>, %arg4: memref<8x128xf32, #tpu.memory_space<vmem>>) attributes {dimension_semantics = [#tpu.dimension_semantics<parallel>, #tpu.dimension_semantics<parallel>], iteration_bounds = array<i64: 1, 1>, scalar_prefetch = 0 : i64, scratch_operands = 0 : i64, tpu.core_type = #tpu.core_type<tc>, window_params = [{transform_indices = @transform_0, window_bounds = array<i64: 8, 32>}, {transform_indices = @transform_1, window_bounds = array<i64: 32, 128>}, {transform_indices = @transform_2, window_bounds = array<i64: 8, 128>}]} {
    %c0 = arith.constant 0 : index
    %c0_0 = arith.constant 0 : index
    %0 = vector.load %arg2[%c0, %c0_0] : memref<8x32xf32, #tpu.memory_space<vmem>>, vector<8x32xf32>
    %c0_1 = arith.constant 0 : index
    %c0_2 = arith.constant 0 : index
    %1 = vector.load %arg3[%c0_1, %c0_2] : memref<32x128xf32, #tpu.memory_space<vmem>>, vector<32x128xf32>
    %cst = arith.constant dense<0.000000e+00> : vector<8x128xf32>
    %2 = tpu.matmul %0, %1, %cst {dimension_numbers = #tpu.dot_dimension_numbers<[1], [0], [0], [1], [0, 0, 1, 1], [], []>, precision = #tpu.contract_precision<fp32>} : vector<8x32xf32>, vector<32x128xf32>, vector<8x128xf32> -> vector<8x128xf32>
    %c0_3 = arith.constant 0 : index
    %c0_4 = arith.constant 0 : index
    %3 = vector.load %arg4[%c0_3, %c0_4] : memref<8x128xf32, #tpu.memory_space<vmem>>, vector<8x128xf32>
    tpu.vector_store %arg4[%c0_3, %c0_4], %2 {strides = array<i32>} : memref<8x128xf32, #tpu.memory_space<vmem>>, vector<8x128xf32>,
    return
  }
  func.func @transform_0(%arg0: i32, %arg1: i32) -> (i32, i32) {
    %c0_i32 = arith.constant 0 : i32
    %c0_i32_0 = arith.constant 0 : i32
    return %arg0, %c0_i32 : i32, i32
  }
  func.func @transform_1(%arg0: i32, %arg1: i32) -> (i32, i32) {
    %c0_i32 = arith.constant 0 : i32
    %c0_i32_0 = arith.constant 0 : i32
    return %c0_i32, %arg1 : i32, i32
  }
  func.func @transform_2(%arg0: i32, %arg1: i32) -> (i32, i32) {
    %c0_i32 = arith.constant 0 : i32
    return %arg0, %arg1 : i32, i32
  }
}

</mosaic_0001>

<bundles_post_ra>
// kernel: tpu_custom_call.1
= control target key start
LH: loop header
LB: loop body
LE: loop exit
PB: predicated region body
PF: predicated region fallthrough
CT: control target
= control target key end

     0   :  { %7 = vsyncpa [#allocation3], 0  ;;  %s860_s0 = inlined_call_operand.hbm [shape: f32[8,32], index: 0, kind: input, shape index: {}]   ;;  %s861_s1 = inlined_call_operand.hbm [shape: f32[32,128], index: 1, kind: input, shape index: {}]   ;;  %s862_s2 = inlined_call_operand.hbm [shape: f32[8,128], index: 2, kind: output, shape index: {}]  }
   0x1   :  { %8 = vsyncpa [#allocation6], 0 }
   0x2   :  { %9 = vsyncpa [#allocation4], 0  ;;  %s770_s9 = smov [#allocation2]   ;;  %s771_s11 = smov [#allocation5]  }
   0x3   :  { %s16_s10 = sshll.u32 %s770_s9, 4  ;;  %s25_s12 = sshll.u32 %s771_s11, 4  ;;  %s17_s10 = int_to_ptr.vmem [resolvable:$true] %s16_s10  ;;  %s793_s12 = int_to_ptr.vmem [resolvable:$true] %s25_s12 }
   0x4   :  { %s698_s15 = scalar_lea.hbm %s860_s0, 128 }
   0x5   :  { %p699_p0 = scmp.ne.s32.totalorder %s860_s0, %s698_s15  ;;  %p702_p1 = scmp.lt.u32.totalorder %s698_s15, %s860_s0 }
   0x7   :  { %p704_p2 = pnand %p702_p1, %p699_p0 }
   0x9   :  { %707 = shalt.err (!%p704_p2)
}
   0xa   :  { %s708_s20 = scalar_lea.vmem %s17_s10, 128  ;;  %p713_p4 = scmp.lt.s32.totalorder %s17_s10, %s17_s10 }
   0xb   :  { %p709_p3 = scmp.ne.s32.totalorder %s17_s10, %s708_s20  ;;  %p714_p5 = scmp.lt.s32.totalorder %s708_s20, %s708_s20 }
   0xd   :  { %p715_p6 = por %p714_p5, %p713_p4 }
   0xf   :  { %p716_p7 = pnand %p715_p6, %p709_p3 }
  0x11   :  { %719 = shalt.err (!%p716_p7)
}
  0x12   :  { %19 = dma.hbm_to_vmem [thread:$0]  %s860_s0, 128, %s17_s10, [#allocation3]  }
  0x13   :  { %s720_s25 = scalar_lea.hbm %s861_s1, 512 }
  0x14   :  { %p721_p8 = scmp.ne.s32.totalorder %s861_s1, %s720_s25  ;;  %p724_p9 = scmp.lt.u32.totalorder %s720_s25, %s861_s1 }
  0x16   :  { %p726_p10 = pnand %p724_p9, %p721_p8 }
  0x18   :  { %729 = shalt.err (!%p726_p10)
}
  0x19   :  { %s730_s30 = scalar_lea.vmem %s793_s12, 512  ;;  %p735_p12 = scmp.lt.s32.totalorder %s793_s12, %s793_s12 }
  0x1a   :  { %p731_p11 = scmp.ne.s32.totalorder %s793_s12, %s730_s30  ;;  %p736_p13 = scmp.lt.s32.totalorder %s730_s30, %s730_s30 }
  0x1c   :  { %p737_p0 = por %p736_p13, %p735_p12 }
  0x1e   :  { %p738_p1 = pnand %p737_p0, %p731_p11 }
  0x20   :  { %741 = shalt.err (!%p738_p1)
}
  0x21   :  { %s772_s0 = smov 128   ;;  %s773_s3 = smov 8  }
  0x22   :  { %31 = dma.hbm_to_vmem [thread:$0]  %s861_s1, 512, %s793_s12, [#allocation6], %s772_s0, %s772_s0, %s773_s3  }
  0x23   :  { %764 = dma.done.wait [#allocation3], 128  }
  0x24   :  { %765 = vsyncadd [#allocation3], 4294967168 }
  0x25   :  { %766 = dma.done.wait [#allocation6], 512  }
  0x26   :  { %767 = vsyncadd [#allocation6], 4294966784  ;;  %v774_v0 = vmov 0.0|0.0   ;;  %vm775_vm0 = vmmov 0   ;;  %v776_v1 = vmov 0.0   ;;  %vm43_vm1 = vcmask 261120  }
  0x27   :  { %645 = vmatprep.subr.bf16.mxu1 %v774_v0  ;;  %663 = vmatprep.subr.bf16.mxu0 %v774_v0  ;;  %v39_v2 = vld [vmem:[#allocation5] sm:$0xff]  ;;  %v40_v3 = vld [vmem:[#allocation5 + $0x8] sm:$0xff]  ;;  %v41_v4 = vld [vmem:[#allocation5 + $0x10] sm:$0xff]  ;;  %s777_s1 = smov [#allocation7]  }
  0x28   :  { %587 = vmatprep.mubr.msk.f32.mxu1 %vm775_vm0, %v776_v1  ;;  %620 = vmatprep.mubr.msk.f32.mxu0 %vm775_vm0, %v776_v1  ;;  %v48_v5 = vand.u32 4294901760, %v39_v2  ;;  %v51_v6 = vand.u32 4294901760, %v40_v3  ;;  %v42_v7 = vld [vmem:[#allocation5 + $0x18] sm:$0xff]  ;;  %v54_v8 = vand.u32 4294901760, %v41_v4  ;;  %s539_s6 = sshll.u32 %s777_s1, 4  ;;  %s540_s6 = int_to_ptr.vmem [resolvable:$true] %s539_s6 }
  0x29   :  { %v38_v9 = vld [vmem:[#allocation2] sm:$0xff]  ;;  %v57_v10 = vand.u32 4294901760, %v42_v7  ;;  %s742_s7 = scalar_lea.vmem %s540_s6, 128  ;;  %p747_p3 = scmp.lt.s32.totalorder %s540_s6, %s540_s6 }
  0x2a   :  { %v45_v11 = vsel %vm43_vm1, %v38_v9, 0  ;;  %v646_v12 = vpack.c.bf16 %v51_v6, %v48_v5  ;;  %v128_v13 = vsub.f32 %v39_v2, %v48_v5  ;;  %v135_v14 = vsub.f32 %v40_v3, %v51_v6  ;;  %p743_p2 = scmp.ne.s32.totalorder %s540_s6, %s742_s7  ;;  %p748_p4 = scmp.lt.s32.totalorder %s742_s7, %s742_s7 }
  0x2b   :  { %v142_v15 = vsub.f32 %v41_v4, %v54_v8  ;;  %v149_v16 = vsub.f32 %v42_v7, %v57_v10  ;;  %v116_v17 = vand.u32 4294901760, %v45_v11  ;;  %v649_v18 = vpack.c.bf16 %v57_v10, %v54_v8 }
  0x2c   :  { %647 = vmatpush3.bf16.msra.mxu1 %v646_v12  ;;  %665 = vmatpush3.bf16.msra.mxu0 %v646_v12  ;;  %v129_v19 = vand.u32 4294901760, %v128_v13  ;;  %v136_v20 = vand.u32 4294901760, %v135_v14  ;;  %v658_v39 = vpack.c.bf16 %v135_v14, %v128_v13  ;;  %p749_p5 = por %p748_p4, %p747_p3 }
  0x2d   :  { %v143_v21 = vand.u32 4294901760, %v142_v15  ;;  %648 = vmatprep.subr.bf16.mxu1 %v774_v0  ;;  %666 = vmatprep.subr.bf16.mxu0 %v774_v0  ;;  %v117_v22 = vsub.f32 %v45_v11, %v116_v17  ;;  %v150_v23 = vand.u32 4294901760, %v149_v16  ;;  %v661_v40 = vpack.c.bf16 %v149_v16, %v142_v15 }
  0x2e   :  { %v130_v24 = vsub.f32 %v128_v13, %v129_v19  ;;  %v137_v25 = vsub.f32 %v135_v14, %v136_v20  ;;  %v670_v31 = vpack.c.bf16 %v136_v20, %v129_v19  ;;  %p750_p6 = pnand %p749_p5, %p743_p2 }
  0x2f   :  { %v144_v26 = vsub.f32 %v142_v15, %v143_v21  ;;  %v118_v27 = vand.u32 4294901760, %v117_v22  ;;  %v151_v28 = vsub.f32 %v149_v16, %v150_v23  ;;  %v673_v37 = vpack.c.bf16 %v150_v23, %v143_v21 }
  0x30   :  { %650 = vmatpush3.bf16.msra.mxu1 %v649_v18  ;;  %668 = vmatpush3.bf16.msra.mxu0 %v649_v18  ;;  %v131_v29 = vand.u32 4294901760, %v130_v24  ;;  %v138_v30 = vand.u32 4294901760, %v137_v25 }
  0x31   :  { %v119_v32 = vsub.f32 %v117_v22, %v118_v27  ;;  %651 = vmatprep.subr.bf16.mxu1 %v774_v0  ;;  %669 = vmatprep.subr.bf16.mxu0 %v774_v0  ;;  %v145_v34 = vand.u32 4294901760, %v144_v26  ;;  %v152_v35 = vand.u32 4294901760, %v151_v28 }
  0x32   :  { %v652_v33 = vpack.c.bf16 %v138_v30, %v131_v29 }
  0x33   :  { %v120_v36 = vand.u32 4294901760, %v119_v32  ;;  %621 = vmatmul.mubr.f32.vlgmr.msra.gmra.mrb[0].mxu0 %v118_v27  ;;  %v655_v38 = vpack.c.bf16 %v152_v35, %v145_v34 }
  0x34   :  { %671 = vmatpush3.bf16.msra.mxu0 %v670_v31  ;;  %631 = vmatprep.mubr.msk.f32.mxu0 %vm775_vm0, %v776_v1 }
  0x35   :  { %588 = vmatmul.mubr.f32.vlgmr.msra.gmra.mrb[0].mxu1 %v120_v36  ;;  %672 = vmatprep.subr.bf16.mxu0 %v774_v0 }
  0x36   :  { %653 = vmatpush3.bf16.msra.mxu1 %v652_v33  ;;  %598 = vmatprep.mubr.msk.f32.mxu1 %vm775_vm0, %v776_v1 }
  0x37   :  { %654 = vmatprep.subr.bf16.mxu1 %v774_v0 }
  0x38   :  { %674 = vmatpush3.bf16.msra.mxu0 %v673_v37 }
  0x39   :  { %675 = vmatprep.subr.bf16.mxu0 %v774_v0 }
  0x3a   :  { %656 = vmatpush3.bf16.msra.mxu1 %v655_v38 }
  0x3b   :  { %657 = vmatprep.subr.bf16.mxu1 %v774_v0  ;;  %632 = vmatmul.mubr.f32.vlgmr.msra.gmra.mrb[0].mxu0 %v116_v17 }
  0x3c   :  { %677 = vmatpush3.bf16.msra.mxu0 %v646_v12  ;;  %642 = vmatprep.mubr.msk.f32.mxu0 %vm775_vm0, %v776_v1 }
  0x3d   :  { %599 = vmatmul.mubr.f32.vlgmr.msra.gmra.mrb[0].mxu1 %v116_v17  ;;  %678 = vmatprep.subr.bf16.mxu0 %v774_v0 }
  0x3e   :  { %659 = vmatpush3.bf16.msra.mxu1 %v658_v39  ;;  %609 = vmatprep.mubr.msk.f32.mxu1 %vm775_vm0, %v776_v1 }
  0x3f   :  { %660 = vmatprep.subr.bf16.mxu1 %v774_v0 }
  0x40   :  { %680 = vmatpush3.bf16.msra.mxu0 %v649_v18 }
  0x42   :  { %662 = vmatpush3.bf16.msra.mxu1 %v661_v40 }
  0x43   :  { %643 = vmatmul.mubr.f32.vlgmr.msra.gmra.mrb[0].mxu0 %v116_v17 }
  0x45   :  { %610 = vmatmul.mubr.f32.vlgmr.msra.gmra.mrb[0].mxu1 %v117_v22 }
 0x116   :  { %v528_v41 = vpop.f32.mrb[0].mxu0 }
 0x117   :  { %v644_v42 = vpop.f32.mrb[1].mxu0 }
 0x118   :  { %v293_v43 = vpop.f32.mrb[0].mxu1 }
 0x119   :  { %v681_v44 = vadd.f32 %v528_v41, %v293_v43  ;;  %v611_v45 = vpop.f32.mrb[1].mxu1 }
 0x11b   :  { %532 = vst [vmem:[#allocation7] sm:$0xff] %v681_v44 }
 0x11c   :  { %753 = shalt.err (!%p750_p6)
}
 0x11d   :  { %s754_s10 = scalar_lea.hbm %s862_s2, 128 }
 0x11e   :  { %p755_p7 = scmp.ne.s32.totalorder %s862_s2, %s754_s10  ;;  %p758_p8 = scmp.lt.u32.totalorder %s754_s10, %s862_s2 }
 0x120   :  { %p760_p9 = pnand %p758_p8, %p755_p7 }
 0x122   :  { %763 = shalt.err (!%p760_p9)
}
 0x123   :  { %542 = dma.vmem_to_hbm [thread:$0]  %s540_s6, 128, %s862_s2, [#allocation4]  }
 0x124   :  { %768 = dma.done.wait [#allocation4], 128  }
 0x125   :  { %769 = vsyncadd [#allocation4], 4294967168 }
 0x126   :  { %546 = vsyncpa [#allocation3], 1 }
 0x127   :  { %547 = vsyncpa [#allocation6], 1 }
 0x128   :  { %548 = vsyncpa [#allocation4], 1 }

</bundles_post_ra>
